<compile_context>
chip_gen: v7x
topology: tpu7x:2x2x1
jax: 0.10.0
libtpu: 0.0.40
codegen_flags: <defaults>
</compile_context>

<pallas_src>
import jax
import jax.numpy as jnp
from jax.experimental import pallas as pl
from jax.experimental.pallas import tpu as pltpu

_CONF = 50.0        # confidence constant from the paper / reference
_NEG_PAD = -1e30    # replacement for out-of-range class lanes (never wins max)


def _round_up(a: int, m: int) -> int:
    return ((a + m - 1) // m) * m


def carlini_wagner_loss(logits: jax.Array, target: jax.Array, *,
                        tb: int = 512, tc: int = 4096) -> jax.Array:
    """logits: (B, C) float (f32/bf16), target: (B,) int -> scalar f32 CW loss."""
    B, C = logits.shape
    in_dtype = logits.dtype
    itemsize = jnp.dtype(in_dtype).itemsize
    sub = 8 * max(1, 4 // itemsize)          # sublane multiple: 8 f32 / 16 bf16

    # ---- tile sizes (no padding; ragged tails handled in-kernel / by Pallas) ----
    tb_cap = max(sub, (tb // sub) * sub)
    # aim for >= 2 batch tiles when B allows, so v7x's two TCs both get work
    want_tb = pl.cdiv(B, 2) if B >= 2 * sub else B
    tb_eff = min(tb_cap, _round_up(max(want_tb, 1), sub))

    tc_cap = max(128, (tc // 128) * 128)
    tc_eff = min(tc_cap, _round_up(C, 128))  # always a multiple of 128

    # ---- generation-aware VMEM budget (v7x: 64 MiB, v5e/v6e: 128 MiB) ----
    try:
        vmem_cap = int(getattr(pltpu.get_tpu_info(), "vmem_capacity_bytes",
                               64 * 1024 * 1024))
    except Exception:
        vmem_cap = 64 * 1024 * 1024
    vmem_budget = int(0.75 * vmem_cap)
    while 4 * tb_eff * tc_eff * itemsize > vmem_budget and tc_eff > 512:
        tc_eff = max(512, _round_up(tc_eff // 2, 128))
    tile_bytes = tb_eff * tc_eff * itemsize
    vmem_limit = int(min(vmem_budget, max(32 * 1024 * 1024, 5 * tile_bytes)))

    n_b = pl.cdiv(B, tb_eff)
    n_c = pl.cdiv(C, tc_eff)
    ragged_c = (C % tc_eff) != 0

    target_2d = target.astype(jnp.int32).reshape(B, 1)

    def kernel(logits_ref, target_ref, out_ref, wrong_ref):
        j = pl.program_id(1)

        @pl.when(j == 0)
        def _():
            wrong_ref[...] = jnp.full(wrong_ref.shape, -jnp.inf, jnp.float32)

        x = logits_ref[...]                      # (tb, tc), stays in HBM dtype
        t_loc = target_ref[...] - j * tc_eff     # (tb, 1) tile-local target index
        cls = jax.lax.broadcasted_iota(jnp.int32, x.shape, 1)

        if ragged_c:
            # classes past C (only possible in the last class tile, which may
            # contain stale VMEM) must never win the max
            x = jnp.where(cls < (C - j * tc_eff), x,
                          jnp.asarray(_NEG_PAD, x.dtype))
        # PyTorch quirk: the zeroed target slot competes in the wrong-max.
        xw = jnp.where(cls == t_loc, jnp.asarray(0.0, x.dtype), x)

        # Lane-dense partial: per-lane VPU maxes across the column vreg groups.
        part = xw[:, 0:128]
        for c in range(1, tc_eff // 128):
            part = jnp.maximum(part, xw[:, c * 128:(c + 1) * 128])
        wrong_ref[...] = jnp.maximum(wrong_ref[...], part.astype(jnp.float32))

        @pl.when(j == n_c - 1)
        def _():
            # single cross-lane (XLU) reduce per batch tile
            out_ref[...] = jnp.max(wrong_ref[...], axis=1, keepdims=True)

    wrong = pl.pallas_call(
        kernel,
        out_shape=jax.ShapeDtypeStruct((B, 1), jnp.float32),
        grid_spec=pltpu.PrefetchScalarGridSpec(
            num_scalar_prefetch=0,
            grid=(n_b, n_c),                     # classes (reduction) last
            in_specs=[
                pl.BlockSpec((tb_eff, tc_eff), lambda i, j: (i, j)),
                pl.BlockSpec((tb_eff, 1), lambda i, j: (i, 0)),
            ],
            out_specs=pl.BlockSpec((tb_eff, 1), lambda i, j: (i, 0)),
            scratch_shapes=[
                pltpu.VMEM((tb_eff, 128), jnp.float32),   # lane-dense running max
            ],
        ),
        compiler_params=pltpu.CompilerParams(
            dimension_semantics=("parallel", "arbitrary"),
            vmem_limit_bytes=vmem_limit,
        ),
        cost_estimate=pl.CostEstimate(
            flops=3 * B * C,
            transcendentals=0,
            bytes_accessed=B * C * itemsize + 2 * B * 4,
        ),
    )(logits, target_2d)

    # "correct" logit hoisted out of the kernel: B-element gather + tiny combine.
    correct = jnp.take_along_axis(logits, target_2d, axis=1).astype(jnp.float32)
    return -jnp.sum(jnp.maximum(correct[:, 0] - wrong[:, 0] + _CONF, 0.0))


def _reference(logits, target):
    C = logits.shape[1]
    x = logits.astype(jnp.float32)
    mask = jax.nn.one_hot(target, C, dtype=jnp.float32)
    correct = jnp.sum(mask * x, axis=1)
    wrong = jnp.max((1.0 - mask) * x, axis=1)
    return -jnp.sum(jax.nn.relu(correct - wrong + 50.0))


if __name__ == "__main__":
    key = jax.random.PRNGKey(0)
    k1, k2, k3, k4, k5, k6 = jax.random.split(key, 6)

    # Case 1: tiny classifier shapes, f32, single (partial) block (grid 1x1).
    B1, C1 = 8, 10
    logits1 = jax.random.normal(k1, (B1, C1), jnp.float32) * 5.0
    target1 = jax.random.randint(k2, (B1,), 0, C1, dtype=jnp.int32)
    loss1 = jax.block_until_ready(carlini_wagner_loss(logits1, target1))
    ref1 = _reference(logits1, target1)
    assert jnp.allclose(loss1, ref1, rtol=1e-5, atol=1e-4), (loss1, ref1)

    # Case 2: bf16 logits, ragged batch tile + ragged class tail (grid 2x3).
    B2, C2 = 24, 300
    logits2 = (jax.random.normal(k3, (B2, C2), jnp.float32) * 5.0
               ).astype(jnp.bfloat16)
    target2 = jax.random.randint(k4, (B2,), 0, C2, dtype=jnp.int32)
    loss2 = jax.block_until_ready(
        carlini_wagner_loss(logits2, target2, tb=16, tc=128))
    ref2 = _reference(logits2, target2)
    assert jnp.allclose(loss2, ref2, rtol=1e-5, atol=1e-4), (loss2, ref2)

    # Case 3: f32, two batch tiles + multi-step class reduction with
    # multi-chunk lane folding (grid 2x3, tc_eff=256).
    B3, C3 = 64, 640
    logits3 = jax.random.normal(k5, (B3, C3), jnp.float32) * 5.0
    target3 = jax.random.randint(k6, (B3,), 0, C3, dtype=jnp.int32)
    loss3 = jax.block_until_ready(carlini_wagner_loss(logits3, target3, tc=256))
    ref3 = _reference(logits3, target3)
    assert jnp.allclose(loss3, ref3, rtol=1e-5, atol=1e-4), (loss3, ref3)

    print("KERNEL_OK")
</pallas_src>

<mosaic_0001>
module attributes {stable_mosaic.version = 11 : i64} {
  func.func @kernel(%arg0: i32, %arg1: i32, %arg2: memref<8x128xf32, #tpu.memory_space<vmem>>, %arg3: memref<8x1xi32, #tpu.memory_space<vmem>>, %arg4: memref<8x1xf32, #tpu.memory_space<vmem>>, %arg5: memref<8x128xf32, #tpu.memory_space<vmem>>) attributes {dimension_semantics = [#tpu.dimension_semantics<parallel>, #tpu.dimension_semantics<arbitrary>], iteration_bounds = array<i64: 1, 1>, scalar_prefetch = 0 : i64, scratch_operands = 1 : i64, tpu.core_type = #tpu.core_type<tc>, window_params = [{transform_indices = @transform_0, window_bounds = array<i64: 8, 128>}, {transform_indices = @transform_1, window_bounds = array<i64: 8, 1>}, {transform_indices = @transform_2, window_bounds = array<i64: 8, 1>}]} {
    %c0_i32 = arith.constant 0 : i32
    %0 = arith.cmpi eq, %arg1, %c0_i32 : i32
    %1 = arith.extui %0 : i1 to i32
    %c0_i32_0 = arith.constant 0 : i32
    %2 = arith.cmpi ne, %1, %c0_i32_0 : i32
    scf.if %2 {
      %cst_12 = arith.constant 0xFF800000 : f32
      %25 = vector.broadcast %cst_12 : f32 to vector<8x128xf32>
      %c0_13 = arith.constant 0 : index
      %c0_14 = arith.constant 0 : index
      %26 = vector.load %arg5[%c0_13, %c0_14] : memref<8x128xf32, #tpu.memory_space<vmem>>, vector<8x128xf32>
      tpu.vector_store %arg5[%c0_13, %c0_14], %25 {strides = array<i32>} : memref<8x128xf32, #tpu.memory_space<vmem>>, vector<8x128xf32>,
    } else {
    }
    %c0 = arith.constant 0 : index
    %c0_1 = arith.constant 0 : index
    %3 = vector.load %arg2[%c0, %c0_1] : memref<8x128xf32, #tpu.memory_space<vmem>>, vector<8x128xf32>
    %c0_2 = arith.constant 0 : index
    %c0_3 = arith.constant 0 : index
    %4 = vector.load %arg3[%c0_2, %c0_3] : memref<8x1xi32, #tpu.memory_space<vmem>>, vector<8x1xi32>
    %c128_i32 = arith.constant 128 : i32
    %5 = arith.muli %arg1, %c128_i32 : i32
    %6 = vector.broadcast %5 : i32 to vector<8x1xi32>
    %7 = arith.subi %4, %6 : vector<8x1xi32>
    %8 = tpu.iota {dimensions = array<i32: 1>} : vector<8x128xi32>
    %c128_i32_4 = arith.constant 128 : i32
    %9 = arith.muli %arg1, %c128_i32_4 : i32
    %c10_i32 = arith.constant 10 : i32
    %10 = arith.subi %c10_i32, %9 : i32
    %11 = vector.broadcast %10 : i32 to vector<8x128xi32>
    %12 = arith.cmpi slt, %8, %11 : vector<8x128xi32>
    %cst = arith.constant -1.000000e+30 : f32
    %13 = vector.broadcast %cst : f32 to vector<8x128xf32>
    %14 = arith.select %12, %3, %13 : vector<8x128xi1>, vector<8x128xf32>
    %15 = vector.broadcast %7 : vector<8x1xi32> to vector<8x128xi32>
    %16 = arith.cmpi eq, %8, %15 : vector<8x128xi32>
    %cst_5 = arith.constant 0.000000e+00 : f32
    %17 = vector.broadcast %cst_5 : f32 to vector<8x128xf32>
    %18 = arith.select %16, %17, %14 : vector<8x128xi1>, vector<8x128xf32>
    %c0_6 = arith.constant 0 : index
    %c0_7 = arith.constant 0 : index
    %19 = vector.load %arg5[%c0_6, %c0_7] : memref<8x128xf32, #tpu.memory_space<vmem>>, vector<8x128xf32>
    %20 = arith.maximumf %19, %18 : vector<8x128xf32>
    %c0_8 = arith.constant 0 : index
    %c0_9 = arith.constant 0 : index
    %21 = vector.load %arg5[%c0_8, %c0_9] : memref<8x128xf32, #tpu.memory_space<vmem>>, vector<8x128xf32>
    tpu.vector_store %arg5[%c0_8, %c0_9], %20 {strides = array<i32>} : memref<8x128xf32, #tpu.memory_space<vmem>>, vector<8x128xf32>,
    %c0_i32_10 = arith.constant 0 : i32
    %22 = arith.cmpi eq, %arg1, %c0_i32_10 : i32
    %23 = arith.extui %22 : i1 to i32
    %c0_i32_11 = arith.constant 0 : i32
    %24 = arith.cmpi ne, %23, %c0_i32_11 : i32
    scf.if %24 {
      %c0_12 = arith.constant 0 : index
      %c0_13 = arith.constant 0 : index
      %25 = vector.load %arg5[%c0_12, %c0_13] : memref<8x128xf32, #tpu.memory_space<vmem>>, vector<8x128xf32>
      %cst_14 = arith.constant dense<0xFF800000> : vector<8xf32>
      %26 = vector.multi_reduction <maximumf>, %25, %cst_14 [1] : vector<8x128xf32> to vector<8xf32>
      %27 = vector.shape_cast %26 : vector<8xf32> to vector<8x1xf32>
      %c0_15 = arith.constant 0 : index
      %c0_16 = arith.constant 0 : index
      %28 = vector.load %arg4[%c0_15, %c0_16] : memref<8x1xf32, #tpu.memory_space<vmem>>, vector<8x1xf32>
      tpu.vector_store %arg4[%c0_15, %c0_16], %27 {strides = array<i32>} : memref<8x1xf32, #tpu.memory_space<vmem>>, vector<8x1xf32>,
    } else {
    }
    return
  }
  func.func @transform_0(%arg0: i32, %arg1: i32) -> (i32, i32) {
    %c0_i32 = arith.constant 0 : i32
    return %arg0, %arg1 : i32, i32
  }
  func.func @transform_1(%arg0: i32, %arg1: i32) -> (i32, i32) {
    %c0_i32 = arith.constant 0 : i32
    %c0_i32_0 = arith.constant 0 : i32
    return %arg0, %c0_i32 : i32, i32
  }
  func.func @transform_2(%arg0: i32, %arg1: i32) -> (i32, i32) {
    %c0_i32 = arith.constant 0 : i32
    %c0_i32_0 = arith.constant 0 : i32
    return %arg0, %c0_i32 : i32, i32
  }
}

</mosaic_0001>

<bundles_post_ra>
// kernel: tpu_custom_call.1
= control target key start
LH: loop header
LB: loop body
LE: loop exit
PB: predicated region body
PF: predicated region fallthrough
CT: control target
= control target key end

     0   :  { %v49_v0 = vmov 0   ;;  %v21_v2 = vlaneseq  ;;  %vm41_vm2 = vcmask 7168   ;;  %s74_s1 = inlined_call_operand.vmem [shape: s32[8,1], index: 1, kind: input, shape index: {}]   ;;  %s75_s0 = inlined_call_operand.vmem [shape: f32[8,10], index: 0, kind: input, shape index: {}]   ;;  %s76_s2 = inlined_call_operand.vmem [shape: f32[8,1], index: 2, kind: output, shape index: {}]  }
   0x1   :  { %48 = vset.pattern.permute.xlu0 %v49_v0  ;;  %v17_v1 = vld [vmem:[%s74_s1] sm:$0xff] }
   0x2   :  { %28 = vperm.xlu0 %48, %v17_v1   ;;  %v22_v3 = vand.u32 127, %v21_v2  ;;  %v16_v4 = vld [vmem:[%s75_s0] sm:$0xff] }
   0x4   :  { %vm25_vm0 = vcmp.lt.s32.totalorder %v22_v3, 10 }
   0x5   :  { %v26_v5 = vsel %vm25_vm0, %v16_v4, -1e+30 }
  0x81   :  { %v29_v6 = vpop.permute.xlu0 %28 }
  0x82   :  { %vm30_vm1 = vcmp.eq.s32.totalorder %v22_v3, %v29_v6 }
  0x83   :  { %v31_v7 = vsel %vm30_vm1, 0.0, %v26_v5 }
  0x84   :  { %39 = vmax.xlane.f32.xlu0 %v31_v7 }
 0x111   :  { %v40_v8 = vpop.xlane.xlu0 %39 }
 0x112   :  { %42 = vst.msk [vmem:[%s76_s2] sm:$0xff] %vm41_vm2, %v40_v8 }

</bundles_post_ra>
